<compile_context>
chip_gen: v6e
topology: v6e:2x2x1
jax: 0.10.0
libtpu: 0.0.40
codegen_flags: <defaults>
</compile_context>

<pallas_src>
import functools

import jax
import jax.numpy as jnp
from jax.experimental import pallas as pl
from jax.experimental.pallas import tpu as pltpu

LANES = 128
_MAX_SCORE_BLOCK_BYTES = 512 * 1024   # ~512 KiB score block (v7x-conservative)
_MIN_TILES = 4                        # aim for >= 4 pipeline steps per (b, s)


def _cdiv(a, b):
    return -(-a // b)


def _choose_tiling(n_rows, n_classes, batch):
    """Pick (split, tile_rows, tiles_per_split) for the (rows, 128) pixel grid."""
    if n_rows <= 8:
        # Tiny pixel axis: one full-dim block per batch, no split.
        return 1, n_rows, 1
    split = 1 if batch % 2 == 0 else 2       # keep both v7x TCs fed for odd B
    rows_per_split = _cdiv(n_rows, split)
    bytes_per_row = n_classes * LANES * 4
    cap = max(8, (_MAX_SCORE_BLOCK_BYTES // bytes_per_row) // 8 * 8)
    want = max(8, _cdiv(_cdiv(rows_per_split, _MIN_TILES), 8) * 8)
    tile_rows = min(cap, want)
    return split, tile_rows, _cdiv(rows_per_split, tile_rows)


def _dice_kernel(score_ref, tgt_ref, out_ref, *, n_classes, acc_rows, n_chunks,
                 tile_rows, tiles_per_split, hw, use_softmax, needs_mask):
    """One grid step: accumulate per-class (intersect, z_sum, y_sum) partials.

    score_ref: (C, tile_rows, 128) float     tgt_ref: (tile_rows, 128) int32
    out_ref  : (3, C-1, acc_rows, 128) f32   VMEM-resident across the pixel axis
    """
    s_idx = pl.program_id(1)
    n_idx = pl.program_id(2)

    @pl.when(n_idx == 0)
    def _():  # fresh accumulator at the start of each (batch, split) sweep
        out_ref[...] = jnp.zeros_like(out_ref)

    n_acc = n_classes - 1
    # One-hot class iota for classes 1..C-1 (class 0 is discarded by the loss,
    # so it is never accumulated).
    cls = jax.lax.broadcasted_iota(jnp.int32, (n_acc, acc_rows, LANES), 0) + 1

    if needs_mask:
        # Intended global start row of this tile.  The index map clamps the
        # DMA'd block; any tile whose *intended* rows lie past the data is
        # fully masked here, so clamped re-reads contribute exactly zero.
        row0 = (s_idx * tiles_per_split + n_idx) * tile_rows
        pix0 = (jax.lax.broadcasted_iota(jnp.int32, (acc_rows, LANES), 0) * LANES
                + jax.lax.broadcasted_iota(jnp.int32, (acc_rows, LANES), 1))

    def chunk_body(j, carry):
        pi, pz, py = carry                                    # (C-1, acc_rows, 128)
        r = pl.multiple_of(j * acc_rows, acc_rows)
        t = tgt_ref[pl.ds(r, acc_rows), :]                    # (acc_rows, 128) int32

        if use_softmax:
            s = score_ref[:, pl.ds(r, acc_rows), :].astype(jnp.float32)
            # Softmax over the class axis: C is a leading (vreg-batch) axis, so
            # max/sum are plain elementwise VALU ops on dense (8,128) tiles.
            m = jnp.max(s, axis=0, keepdims=True)
            e = jnp.exp(s - m)
            s = e * pl.reciprocal(jnp.sum(e, axis=0, keepdims=True), approx=True)
            sa = s[1:]                                        # drop class 0
        else:
            # Raw-score path never touches class-0 data in vregs.
            sa = score_ref[pl.ds(1, n_acc), pl.ds(r, acc_rows), :].astype(jnp.float32)

        if needs_mask:
            valid = pix0 < (hw - (row0 + j * acc_rows) * LANES)
            t = jnp.where(valid, t, -1)                       # one-hot -> 0
            sa = jnp.where(valid[None], sa, 0.0)              # keeps z_sum clean

        onehot = jnp.where(t[None] == cls, 1.0, 0.0)          # (C-1, acc_rows, 128)
        return pi + sa * onehot, pz + sa * sa, py + onehot

    zero = jnp.zeros((n_acc, acc_rows, LANES), jnp.float32)
    pi, pz, py = jax.lax.fori_loop(0, n_chunks, chunk_body, (zero, zero, zero),
                                   unroll=min(n_chunks, 8))
    out_ref[0] += pi     # per-class intersect partials (lane/sublane dense)
    out_ref[1] += pz     # per-class sum(score^2) partials
    out_ref[2] += py     # per-class sum(onehot)  partials


def dice_loss_pallas(inputs, target, n_classes, weight=None, softmax=False):
    """inputs: (B, C, H, W) float logits/scores; target: (B, H, W) int labels.
    Returns the scalar multi-class soft Dice loss over classes 1..C-1."""
    B, C, H, W = inputs.shape
    assert C == n_classes, "channel dim must equal n_classes"
    assert n_classes >= 2, "DiceLoss divides by (n_classes - 1)"
    if weight is None:
        weight = [1.0] * n_classes
    assert len(weight) == n_classes, "weight must have n_classes entries"

    HW = H * W
    n_rows = _cdiv(HW, LANES)
    pad_px = n_rows * LANES - HW

    score = inputs.reshape(B, C, HW)
    tgt = target.reshape(B, HW).astype(jnp.int32)
    if pad_px:
        # TODO(synk): lane-unaligned H*W still costs one HBM pad copy to make
        # the (rows, 128) layout reshapeable; the tail math itself is masked
        # in-kernel.
        score = jnp.pad(score, ((0, 0), (0, 0), (0, pad_px)))
        tgt = jnp.pad(tgt, ((0, 0), (0, pad_px)), constant_values=-1)
    score = score.reshape(B, C, n_rows, LANES)   # sublane/lane-dense layout
    tgt = tgt.reshape(B, n_rows, LANES)

    split, tile_rows, tiles_per_split = _choose_tiling(n_rows, C, B)
    acc_rows = min(8, tile_rows)
    n_chunks = tile_rows // acc_rows
    needs_mask = (split * tiles_per_split * tile_rows * LANES != HW)
    n_row_blocks = _cdiv(n_rows, tile_rows)
    n_acc = C - 1

    def _row_block(s, n):
        # Clamp over-coverage tiles onto the last real block; their intended
        # rows are >= HW so the in-kernel mask zeroes their contribution.
        return jnp.minimum(s * tiles_per_split + n, n_row_blocks - 1)

    kernel = functools.partial(
        _dice_kernel, n_classes=C, acc_rows=acc_rows, n_chunks=n_chunks,
        tile_rows=tile_rows, tiles_per_split=tiles_per_split, hw=HW,
        use_softmax=softmax, needs_mask=needs_mask)

    parts = pl.pallas_call(
        kernel,
        out_shape=jax.ShapeDtypeStruct((B, split, 3, n_acc, acc_rows, LANES),
                                       jnp.float32),
        grid_spec=pltpu.PrefetchScalarGridSpec(
            num_scalar_prefetch=0,
            grid=(B, split, tiles_per_split),
            in_specs=[
                pl.BlockSpec((None, C, tile_rows, LANES),
                             lambda b, s, n: (b, 0, _row_block(s, n), 0)),
                pl.BlockSpec((None, tile_rows, LANES),
                             lambda b, s, n: (b, _row_block(s, n), 0)),
            ],
            out_specs=pl.BlockSpec((None, None, 3, n_acc, acc_rows, LANES),
                                   lambda b, s, n: (b, s, 0, 0, 0, 0)),
        ),
        compiler_params=pltpu.CompilerParams(
            dimension_semantics=("parallel", "parallel", "arbitrary")),
    )(score, tgt)

    # Tiny XLA epilogue: collapse batch/split/row/lane partials, weighted Dice.
    sums = jnp.sum(parts, axis=(0, 1, 4, 5))                  # (3, C-1)
    intersect, z_sum, y_sum = sums[0], sums[1], sums[2]
    smooth = 1e-5
    dice = 1.0 - (2.0 * intersect + smooth) / (z_sum + y_sum + smooth)  # (C-1,)
    w = jnp.asarray(weight, jnp.float32)
    return jnp.sum(dice * w[1:]) / (n_classes - 1)


def _dice_loss_ref(inputs, target, n_classes, weight=None, softmax=False):
    """Pure-JAX reference mirroring the PyTorch DiceLoss.forward."""
    if softmax:
        inputs = jax.nn.softmax(inputs, axis=1)
    onehot = (target[:, None, :, :] ==
              jnp.arange(n_classes)[None, :, None, None]).astype(jnp.float32)
    if weight is None:
        weight = [1.0] * n_classes
    smooth = 1e-5
    loss = 0.0
    for i in range(1, n_classes):
        s = inputs[:, i]
        t = onehot[:, i]
        intersect = jnp.sum(s * t)
        y_sum = jnp.sum(t * t)
        z_sum = jnp.sum(s * s)
        dice = 1.0 - (2.0 * intersect + smooth) / (z_sum + y_sum + smooth)
        loss = loss + dice * weight[i]
    return loss / (n_classes - 1)


if __name__ == "__main__":
    B, C, H, W = 2, 4, 16, 16
    key = jax.random.PRNGKey(0)
    k_x, k_t = jax.random.split(key)
    x = jax.random.normal(k_x, (B, C, H, W), dtype=jnp.float32)       # NCHW logits
    t = jax.random.randint(k_t, (B, H, W), 0, C, dtype=jnp.int32)     # class labels

    # 1) Softmax path (approx EUP reciprocal -> slightly looser tolerance).
    out_sm = jax.block_until_ready(
        dice_loss_pallas(x, t, n_classes=C, weight=None, softmax=True))
    ref_sm = _dice_loss_ref(x, t, n_classes=C, weight=None, softmax=True)
    assert jnp.allclose(out_sm, ref_sm, rtol=2e-3, atol=2e-3), (out_sm, ref_sm)

    # 2) Raw-score path with explicit class weights (exact math).
    wts = [0.0, 1.0, 2.0, 0.5]
    out_raw = jax.block_until_ready(
        dice_loss_pallas(x, t, n_classes=C, weight=wts, softmax=False))
    ref_raw = _dice_loss_ref(x, t, n_classes=C, weight=wts, softmax=False)
    assert jnp.allclose(out_raw, ref_raw, rtol=1e-4, atol=1e-5), (out_raw, ref_raw)

    # 3) Lane-unaligned spatial size: exercises the in-kernel tail mask.
    x3 = jax.random.normal(k_x, (1, C, 10, 10), dtype=jnp.float32)
    t3 = jax.random.randint(k_t, (1, 10, 10), 0, C, dtype=jnp.int32)
    out3 = jax.block_until_ready(dice_loss_pallas(x3, t3, C, softmax=True))
    ref3 = _dice_loss_ref(x3, t3, C, softmax=True)
    assert jnp.allclose(out3, ref3, rtol=2e-3, atol=2e-3), (out3, ref3)

    # 4) Odd batch + non-dividing tiles: exercises the 2-way split axis,
    #    clamped index map and row-tail masking.
    x4 = jax.random.normal(k_x, (1, C, 48, 64), dtype=jnp.float32)
    t4 = jax.random.randint(k_t, (1, 48, 64), 0, C, dtype=jnp.int32)
    out4 = jax.block_until_ready(dice_loss_pallas(x4, t4, C, softmax=False))
    ref4 = _dice_loss_ref(x4, t4, C, softmax=False)
    assert jnp.allclose(out4, ref4, rtol=1e-4, atol=1e-5), (out4, ref4)

    print("KERNEL_OK")
</pallas_src>

<mosaic_0001>
module attributes {stable_mosaic.version = 11 : i64} {
  func.func @_dice_kernel(%arg0: i32, %arg1: i32, %arg2: i32, %arg3: memref<1x4x2x128xf32, #tpu.memory_space<vmem>>, %arg4: memref<1x2x128xi32, #tpu.memory_space<vmem>>, %arg5: memref<1x1x3x3x2x128xf32, #tpu.memory_space<vmem>>) attributes {dimension_semantics = [#tpu.dimension_semantics<parallel>, #tpu.dimension_semantics<parallel>, #tpu.dimension_semantics<arbitrary>], iteration_bounds = array<i64: 2, 1, 1>, scalar_prefetch = 0 : i64, scratch_operands = 0 : i64, tpu.core_type = #tpu.core_type<tc>, window_params = [{transform_indices = @transform_0, window_bounds = array<i64: 1, 4, 2, 128>}, {transform_indices = @transform_1, window_bounds = array<i64: 1, 2, 128>}, {transform_indices = @transform_2, window_bounds = array<i64: 1, 1, 3, 3, 2, 128>}]} {
    %c0_i32 = arith.constant 0 : i32
    %0 = arith.cmpi eq, %arg2, %c0_i32 : i32
    %1 = arith.extui %0 : i1 to i32
    %c0_i32_0 = arith.constant 0 : i32
    %2 = arith.cmpi ne, %1, %c0_i32_0 : i32
    scf.if %2 {
      %cst_45 = arith.constant 0.000000e+00 : f32
      %55 = vector.broadcast %cst_45 : f32 to vector<3x3x2x128xf32>
      %c0_46 = arith.constant 0 : index
      %c0_47 = arith.constant 0 : index
      %c0_48 = arith.constant 0 : index
      %c0_49 = arith.constant 0 : index
      %c0_50 = arith.constant 0 : index
      %c0_51 = arith.constant 0 : index
      %56 = vector.load %arg5[%c0_46, %c0_47, %c0_48, %c0_49, %c0_50, %c0_51] : memref<1x1x3x3x2x128xf32, #tpu.memory_space<vmem>>, vector<1x1x3x3x2x128xf32>
      %57 = vector.shape_cast %56 : vector<1x1x3x3x2x128xf32> to vector<3x3x2x128xf32>
      %58 = vector.shape_cast %55 : vector<3x3x2x128xf32> to vector<1x1x3x3x2x128xf32>
      tpu.vector_store %arg5[%c0_46, %c0_47, %c0_48, %c0_49, %c0_50, %c0_51], %58 {strides = array<i32>} : memref<1x1x3x3x2x128xf32, #tpu.memory_space<vmem>>, vector<1x1x3x3x2x128xf32>,
    } else {
    }
    %3 = tpu.iota {dimensions = array<i32: 0>} : vector<3x2x128xi32>
    %c1_i32 = arith.constant 1 : i32
    %4 = vector.broadcast %c1_i32 : i32 to vector<3x2x128xi32>
    %5 = arith.addi %3, %4 : vector<3x2x128xi32>
    %cst = arith.constant 0.000000e+00 : f32
    %6 = vector.broadcast %cst : f32 to vector<3x2x128xf32>
    %c0_i32_1 = arith.constant 0 : i32
    %c2_i32 = arith.constant 2 : i32
    %7 = arith.muli %c0_i32_1, %c2_i32 : i32
    %8 = tpu.assume_multiple %7, 2 : i32
    %c0 = arith.constant 0 : index
    %9 = arith.index_cast %8 : i32 to index
    %c0_2 = arith.constant 0 : index
    %10 = vector.load %arg4[%c0, %9, %c0_2] : memref<1x2x128xi32, #tpu.memory_space<vmem>>, vector<1x2x128xi32>
    %11 = vector.shape_cast %10 : vector<1x2x128xi32> to vector<2x128xi32>
    %c0_3 = arith.constant 0 : index
    %c0_4 = arith.constant 0 : index
    %12 = arith.index_cast %8 : i32 to index
    %c0_5 = arith.constant 0 : index
    %13 = vector.load %arg3[%c0_3, %c0_4, %12, %c0_5] : memref<1x4x2x128xf32, #tpu.memory_space<vmem>>, vector<1x4x2x128xf32>
    %14 = vector.shape_cast %13 : vector<1x4x2x128xf32> to vector<4x2x128xf32>
    %cst_6 = arith.constant dense<0xFF800000> : vector<2x128xf32>
    %15 = vector.multi_reduction <maximumf>, %14, %cst_6 [0] : vector<4x2x128xf32> to vector<2x128xf32>
    %16 = vector.shape_cast %15 : vector<2x128xf32> to vector<1x2x128xf32>
    %17 = vector.broadcast %16 : vector<1x2x128xf32> to vector<4x2x128xf32>
    %18 = arith.subf %14, %17 : vector<4x2x128xf32>
    %19 = math.exp %18 : vector<4x2x128xf32>
    %cst_7 = arith.constant dense<0.000000e+00> : vector<2x128xf32>
    %20 = vector.multi_reduction <add>, %19, %cst_7 [0] : vector<4x2x128xf32> to vector<2x128xf32>
    %21 = vector.shape_cast %20 : vector<2x128xf32> to vector<1x2x128xf32>
    %22 = tpu.reciprocal %21 {approx = true} : vector<1x2x128xf32> -> vector<1x2x128xf32>
    %23 = vector.broadcast %22 : vector<1x2x128xf32> to vector<4x2x128xf32>
    %24 = arith.mulf %19, %23 : vector<4x2x128xf32>
    %25 = vector.extract_strided_slice %24 {offsets = [1, 0, 0], sizes = [3, 2, 128], strides = [1, 1, 1]} : vector<4x2x128xf32> to vector<3x2x128xf32>
    %26 = vector.shape_cast %11 : vector<2x128xi32> to vector<1x2x128xi32>
    %27 = vector.broadcast %26 : vector<1x2x128xi32> to vector<3x2x128xi32>
    %28 = arith.cmpi eq, %27, %5 : vector<3x2x128xi32>
    %cst_8 = arith.constant 1.000000e+00 : f32
    %cst_9 = arith.constant 0.000000e+00 : f32
    %29 = vector.broadcast %cst_8 : f32 to vector<3x2x128xf32>
    %30 = vector.broadcast %cst_9 : f32 to vector<3x2x128xf32>
    %31 = arith.select %28, %29, %30 : vector<3x2x128xi1>, vector<3x2x128xf32>
    %32 = arith.mulf %25, %31 : vector<3x2x128xf32>
    %33 = arith.addf %6, %32 : vector<3x2x128xf32>
    %34 = arith.mulf %25, %25 : vector<3x2x128xf32>
    %35 = arith.addf %6, %34 : vector<3x2x128xf32>
    %36 = arith.addf %6, %31 : vector<3x2x128xf32>
    %c1_i32_10 = arith.constant 1 : i32
    %c0_11 = arith.constant 0 : index
    %c0_12 = arith.constant 0 : index
    %c0_13 = arith.constant 0 : index
    %c0_14 = arith.constant 0 : index
    %c0_15 = arith.constant 0 : index
    %c0_16 = arith.constant 0 : index
    %37 = vector.load %arg5[%c0_11, %c0_12, %c0_13, %c0_14, %c0_15, %c0_16] : memref<1x1x3x3x2x128xf32, #tpu.memory_space<vmem>>, vector<1x1x1x3x2x128xf32>
    %38 = vector.shape_cast %37 : vector<1x1x1x3x2x128xf32> to vector<3x2x128xf32>
    %39 = arith.addf %38, %33 : vector<3x2x128xf32>
    %c0_17 = arith.constant 0 : index
    %c0_18 = arith.constant 0 : index
    %c0_19 = arith.constant 0 : index
    %c0_20 = arith.constant 0 : index
    %c0_21 = arith.constant 0 : index
    %c0_22 = arith.constant 0 : index
    %40 = vector.load %arg5[%c0_17, %c0_18, %c0_19, %c0_20, %c0_21, %c0_22] : memref<1x1x3x3x2x128xf32, #tpu.memory_space<vmem>>, vector<1x1x1x3x2x128xf32>
    %41 = vector.shape_cast %40 : vector<1x1x1x3x2x128xf32> to vector<3x2x128xf32>
    %42 = vector.shape_cast %39 : vector<3x2x128xf32> to vector<1x1x1x3x2x128xf32>
    tpu.vector_store %arg5[%c0_17, %c0_18, %c0_19, %c0_20, %c0_21, %c0_22], %42 {strides = array<i32>} : memref<1x1x3x3x2x128xf32, #tpu.memory_space<vmem>>, vector<1x1x1x3x2x128xf32>,
    %c0_23 = arith.constant 0 : index
    %c0_24 = arith.constant 0 : index
    %c1 = arith.constant 1 : index
    %c0_25 = arith.constant 0 : index
    %c0_26 = arith.constant 0 : index
    %c0_27 = arith.constant 0 : index
    %43 = vector.load %arg5[%c0_23, %c0_24, %c1, %c0_25, %c0_26, %c0_27] : memref<1x1x3x3x2x128xf32, #tpu.memory_space<vmem>>, vector<1x1x1x3x2x128xf32>
    %44 = vector.shape_cast %43 : vector<1x1x1x3x2x128xf32> to vector<3x2x128xf32>
    %45 = arith.addf %44, %35 : vector<3x2x128xf32>
    %c0_28 = arith.constant 0 : index
    %c0_29 = arith.constant 0 : index
    %c1_30 = arith.constant 1 : index
    %c0_31 = arith.constant 0 : index
    %c0_32 = arith.constant 0 : index
    %c0_33 = arith.constant 0 : index
    %46 = vector.load %arg5[%c0_28, %c0_29, %c1_30, %c0_31, %c0_32, %c0_33] : memref<1x1x3x3x2x128xf32, #tpu.memory_space<vmem>>, vector<1x1x1x3x2x128xf32>
    %47 = vector.shape_cast %46 : vector<1x1x1x3x2x128xf32> to vector<3x2x128xf32>
    %48 = vector.shape_cast %45 : vector<3x2x128xf32> to vector<1x1x1x3x2x128xf32>
    tpu.vector_store %arg5[%c0_28, %c0_29, %c1_30, %c0_31, %c0_32, %c0_33], %48 {strides = array<i32>} : memref<1x1x3x3x2x128xf32, #tpu.memory_space<vmem>>, vector<1x1x1x3x2x128xf32>,
    %c0_34 = arith.constant 0 : index
    %c0_35 = arith.constant 0 : index
    %c2 = arith.constant 2 : index
    %c0_36 = arith.constant 0 : index
    %c0_37 = arith.constant 0 : index
    %c0_38 = arith.constant 0 : index
    %49 = vector.load %arg5[%c0_34, %c0_35, %c2, %c0_36, %c0_37, %c0_38] : memref<1x1x3x3x2x128xf32, #tpu.memory_space<vmem>>, vector<1x1x1x3x2x128xf32>
    %50 = vector.shape_cast %49 : vector<1x1x1x3x2x128xf32> to vector<3x2x128xf32>
    %51 = arith.addf %50, %36 : vector<3x2x128xf32>
    %c0_39 = arith.constant 0 : index
    %c0_40 = arith.constant 0 : index
    %c2_41 = arith.constant 2 : index
    %c0_42 = arith.constant 0 : index
    %c0_43 = arith.constant 0 : index
    %c0_44 = arith.constant 0 : index
    %52 = vector.load %arg5[%c0_39, %c0_40, %c2_41, %c0_42, %c0_43, %c0_44] : memref<1x1x3x3x2x128xf32, #tpu.memory_space<vmem>>, vector<1x1x1x3x2x128xf32>
    %53 = vector.shape_cast %52 : vector<1x1x1x3x2x128xf32> to vector<3x2x128xf32>
    %54 = vector.shape_cast %51 : vector<3x2x128xf32> to vector<1x1x1x3x2x128xf32>
    tpu.vector_store %arg5[%c0_39, %c0_40, %c2_41, %c0_42, %c0_43, %c0_44], %54 {strides = array<i32>} : memref<1x1x3x3x2x128xf32, #tpu.memory_space<vmem>>, vector<1x1x1x3x2x128xf32>,
    return
  }
  func.func @transform_0(%arg0: i32, %arg1: i32, %arg2: i32) -> (i32, i32, i32, i32) {
    %c1_i32 = arith.constant 1 : i32
    %0 = arith.muli %arg1, %c1_i32 : i32
    %1 = arith.addi %0, %arg2 : i32
    %c0_i32 = arith.constant 0 : i32
    %2 = arith.minsi %1, %c0_i32 : i32
    %c0_i32_0 = arith.constant 0 : i32
    %c0_i32_1 = arith.constant 0 : i32
    %c0_i32_2 = arith.constant 0 : i32
    return %arg0, %c0_i32_0, %2, %c0_i32_1 : i32, i32, i32, i32
  }
  func.func @transform_1(%arg0: i32, %arg1: i32, %arg2: i32) -> (i32, i32, i32) {
    %c1_i32 = arith.constant 1 : i32
    %0 = arith.muli %arg1, %c1_i32 : i32
    %1 = arith.addi %0, %arg2 : i32
    %c0_i32 = arith.constant 0 : i32
    %2 = arith.minsi %1, %c0_i32 : i32
    %c0_i32_0 = arith.constant 0 : i32
    %c0_i32_1 = arith.constant 0 : i32
    return %arg0, %2, %c0_i32_0 : i32, i32, i32
  }
  func.func @transform_2(%arg0: i32, %arg1: i32, %arg2: i32) -> (i32, i32, i32, i32, i32, i32) {
    %c0_i32 = arith.constant 0 : i32
    %c0_i32_0 = arith.constant 0 : i32
    %c0_i32_1 = arith.constant 0 : i32
    %c0_i32_2 = arith.constant 0 : i32
    %c0_i32_3 = arith.constant 0 : i32
    return %arg0, %arg1, %c0_i32, %c0_i32_0, %c0_i32_1, %c0_i32_2 : i32, i32, i32, i32, i32, i32
  }
}

</mosaic_0001>

<bundles_post_ra>
// kernel: tpu_custom_call.1
= control target key start
LH: loop header
LB: loop body
LE: loop exit
PB: predicated region body
PF: predicated region fallthrough
CT: control target
= control target key end

     0   :  { %7 = vsyncpa [#allocation3], 0  ;;  %s970_s0 = inlined_call_operand.hbm [shape: f32[2,4,2,128], index: 0, kind: input, shape index: {}]   ;;  %s971_s1 = inlined_call_operand.hbm [shape: s32[2,2,128], index: 1, kind: input, shape index: {}]   ;;  %s972_s2 = inlined_call_operand.hbm [shape: f32[2,1,3,3,2,128], index: 2, kind: output, shape index: {}]  }
   0x1   :  { %9 = vsyncpa [#allocation3 + $0x1], 0 }
   0x2   :  { %10 = vsyncpa [#allocation6], 0 }
   0x3   :  { %12 = vsyncpa [#allocation6 + $0x1], 0 }
   0x4   :  { %13 = vsyncpa [#allocation4], 0 }
   0x5   :  { %15 = vsyncpa [#allocation4 + $0x1], 0  ;;  %s755_s9 = smov 0   ;;  %s757_s10 = smov 0  }
   0x6   :  { %s759_s11 = smov 0   ;;  %s761_s12 = smov 0  }
   0x7   :  { %s763_s13 = smov 0   ;;  %s765_s14 = smov 0  }
   0x8 LB: > { %s478_s15 = sadd.s32 4294967295, %s730_s14   ;;  %s479_s16 = sadd.s32 4294967294, %s730_s14   ;;  %s730_s14 = sphi %s765_s14, %s21_s14   ;;  %s726_s13 = sphi %s763_s13, %s983_s13   ;;  %s722_s12 = sphi %s761_s12, %s982_s12   ;;  %s718_s11 = sphi %s759_s11, %s981_s11   ;;  %s714_s10 = sphi %s757_s10, %s980_s10   ;;  %s710_s9 = sphi %s755_s9, %s979_s9  }
   0x9   : > { %s40_s17 = sadd.s32 1, %s726_s13  ;;  %s55_s18 = sadd.s32 1, %s718_s11 }
   0xa   : > { %p42_p0 = scmp.ge.s32.totalorder %s40_s17, 2  ;;  %p62_p1 = scmp.ne.s32.totalorder %s718_s11, %s714_s10 }
   0xb   : > { %p63_p2 = scmp.eq.s32.totalorder %s730_s14, 0  ;;  %p68_p3 = scmp.ne.s32.totalorder %s714_s10, %s710_s9 }
   0xc   : > { %s985_s17 = smov (%p42_p0, %s40_s17), 0  ;;  %p69_p5 = scmp.eq.s32.totalorder %s478_s15, 0 }
   0xd   : > { %p796_p4 = por %p63_p2, %p62_p1  ;;  %s50_s20 = ssub.s32 %s726_s13, %s985_s17 }
   0xe   : > { %p128_p6 = scmp.eq.s32.totalorder %s478_s15, 1  ;;  %p53_p7 = scmp.eq.s32.totalorder %s50_s20, 0 }
   0xf   : > { %p802_p8 = por %p69_p5, %p68_p3  ;;  %p134_p10 = scmp.eq.s32.totalorder %s479_s16, 1 }
  0x10   : > { %p806_p9 = por %p128_p6, %p62_p1  ;;  %p481_p12 = scmp.ge.s32.totalorder %s730_s14, 2 }
  0x11   : > { %s811_s23 = scalar_select %p53_p7, %s718_s11, %s55_s18  }
  0x12   : > { %p813_p11 = por %p134_p10, %p68_p3  ;;  %p525_p13 = scmp.lt.s32.totalorder %s730_s14, 2 }
  0x13   : > { %s820_s25 = sand.u32 1, %s718_s11   ;;  %s505_s27 = sshll.u32 %s726_s13, 7 }
  0x14   : > { %s482_s26 = sshll.u32 %s820_s25, 3  ;;  %s168_s30 = scalar_lea.hbm %s970_s0, %s505_s27 }
  0x15   : > { %s158_s3 = scalar_lea.vmem [#allocation2], %s482_s26  ;;  %p829_p0 = pnand %p525_p13, %p796_p4 }
  0x16   : > { %s169_s4 = sshll.u32 %s158_s3, 4  ;;  %p487_p1 = scmp.ge.s32.totalorder %s730_s14, 1  ;;  %s170_s4 = int_to_ptr.vmem [resolvable:$true] %s169_s4 }
  0x17   : > { %s155_s6 = scalar_lea.sflag [#allocation3], %s820_s25  ;;  %p592_p2 = pneg %p829_p0 }
  0x18   : > { %s603_s7 = scalar_lea.vmem %s170_s4, 128  ;;  %s732_s8 = smov [#allocation2]  }
  0x19   : > { %p604_p3 = scmp.ne.s32.totalorder %s170_s4, %s603_s7  ;;  %s608_s15 = sshll.u32 %s732_s8, 4  ;;  %s609_s15 = int_to_ptr.vmem [resolvable:$false] %s608_s15 }
  0x1a   : > { %s610_s16 = scalar_lea.vmem %s609_s15, 256  ;;  %p611_p4 = scmp.lt.s32.totalorder %s170_s4, %s609_s15 }
  0x1b   : > { %p606_p5 = pnand %p604_p3, %p592_p2  ;;  %p612_p7 = scmp.lt.s32.totalorder %s610_s16, %s603_s7 }
  0x1d   : > { %p607_p6 = pneg %p606_p5  ;;  %p613_p10 = por %p612_p7, %p611_p4 }
  0x1f   : > { %p614_p13 = pnand %p613_p10, %p607_p6 }
  0x21   : > { %617 = shalt.err (!%p614_p13)
}
  0x22   : > { %s733_s18 = smov 32   ;;  %s734_s19 = smov 2  }
  0x23   : > { %517 = dma.hbm_to_vmem [thread:$0]  (!%p829_p0), %s168_s30, 128, %s170_s4, %s155_s6, %s733_s18, %s733_s18, %s734_s19  }
  0x24   : > { %p199_p3 = scmp.lt.s32.totalorder %s730_s14, 3  ;;  %s485_s20 = sshll.u32 %s820_s25, 1 }
  0x25   : > { %s486_s26 = sshll.u32 %s726_s13, 5  ;;  %s183_s7 = scalar_lea.vmem [#allocation5], %s485_s20 }
  0x26   : > { %p847_p5 = pnand %p487_p1, %p199_p3  ;;  %s192_s3 = scalar_lea.hbm %s971_s1, %s486_s26 }
  0x27   : > { %s194_s8 = sshll.u32 %s183_s7, 4  ;;  %s180_s15 = scalar_lea.sflag [#allocation6], %s820_s25  ;;  %s195_s8 = int_to_ptr.vmem [resolvable:$true] %s194_s8 }
  0x28   : > { %s631_s16 = scalar_lea.vmem %s195_s8, 32  ;;  %s735_s30 = smov [#allocation5]  }
  0x29   : > { %p632_p6 = scmp.ne.s32.totalorder %s195_s8, %s631_s16  ;;  %s636_s4 = sshll.u32 %s735_s30, 4  ;;  %s637_s4 = int_to_ptr.vmem [resolvable:$false] %s636_s4 }
  0x2a   : > { %s638_s6 = scalar_lea.vmem %s637_s4, 64  ;;  %p639_p1 = scmp.lt.s32.totalorder %s195_s8, %s637_s4 }
  0x2b   : > { %p634_p4 = pnand %p632_p6, %p592_p2  ;;  %p640_p10 = scmp.lt.s32.totalorder %s638_s6, %s631_s16 }
  0x2d   : > { %p635_p7 = pneg %p634_p4  ;;  %p641_p13 = por %p640_p10, %p639_p1 }
  0x2f   : > { %p642_p3 = pnand %p641_p13, %p635_p7 }
  0x31   : > { %645 = shalt.err (!%p642_p3)
}
  0x32   : > { %520 = dma.hbm_to_vmem [thread:$0]  (!%p829_p0), %s192_s3, 32, %s195_s8, %s180_s15  }
  0x33   : > { %203 = sbr.rel (%p847_p5) target bundleno = 130 (0x82), region = 28  ;;  %s863_s25 = sand.u32 (!%p847_p5), 1, %s714_s10  }
  0x34   : > { %s488_s18 = sshll.u32 (!%p847_p5), %s863_s25, 3  ;;  %s206_s19 = scalar_lea.sflag (!%p847_p5), [#allocation3], %s863_s25 }
  0x35   : > { %s209_s20 = scalar_lea.vmem (!%p847_p5), [#allocation2], %s488_s18 }
  0x38   : > { %697 = dma.done.wait (%p802_p8), %s206_s19, 128  }
  0x39   : > { %699 = vsyncadd (%p802_p8), %s206_s19, 4294967168  ;;  %s489_s5 = sshll.u32 %s863_s25, 1  ;;  %s215_s26 = scalar_lea.sflag [#allocation6], %s863_s25 }
  0x3a   : > { %s218_s27 = scalar_lea.vmem [#allocation5], %s489_s5 }
  0x3b   : > { %701 = dma.done.wait (%p802_p8), %s215_s26, 32  }
  0x3c   : > { %703 = vsyncadd (%p802_p8), %s215_s26, 4294967264  ;;  %s506_s28 = smul.u32 18, %s863_s25  ;;  %v736_v0 = vmov 0.0   ;;  %vm268_vm0 = vcmask 1041408   ;;  %v263_v1 = vld [vmem:[%s218_s27] sm:$0x3] }
  0x3d   : > { %v264_v2 = vld [vmem:[%s209_s20] sm:$0x3]  ;;  %v265_v3 = vld [vmem:[%s209_s20 + $0x2] sm:$0x3]  ;;  %v266_v4 = vld [vmem:[%s209_s20 + $0x4] sm:$0x3] }
  0x3e   : > { %s878_s29 = scalar_lea.vmem [#allocation7], %s506_s28  ;;  %v267_v5 = vld [vmem:[%s209_s20 + $0x6] sm:$0x3]  ;;  %v269_v6 = vsel %vm268_vm0, %v264_v2, -inf  ;;  %v270_v7 = vsel %vm268_vm0, %v265_v3, -inf  ;;  %v271_v8 = vsel %vm268_vm0, %v266_v4, -inf }
  0x3f   : > { %254 = vst [vmem:[%s878_s29] sm:$0x3] %v736_v0  ;;  %255 = vst [vmem:[%s878_s29 + $0x2] sm:$0x3] %v736_v0  ;;  %v272_v9 = vsel %vm268_vm0, %v267_v5, -inf  ;;  %v273_v10 = vmax.f32 %v269_v6, %v270_v7  ;;  %vm299_vm1 = vcmp.eq.s32.totalorder %v263_v1, 1  ;;  %vm300_vm2 = vcmp.eq.s32.totalorder %v263_v1, 2 }
  0x40   : > { %256 = vst [vmem:[%s878_s29 + $0x4] sm:$0x3] %v736_v0  ;;  %257 = vst [vmem:[%s878_s29 + $0x6] sm:$0x3] %v736_v0  ;;  %v274_v11 = vmax.f32 %v271_v8, %v272_v9  ;;  %vm301_vm3 = vcmp.eq.s32.totalorder %v263_v1, 3  ;;  %v302_v13 = vsel %vm299_vm1, 1.0, %v736_v0 }
  0x41   : > { %258 = vst [vmem:[%s878_s29 + $0x8] sm:$0x3] %v736_v0  ;;  %259 = vst [vmem:[%s878_s29 + $0xa] sm:$0x3] %v736_v0  ;;  %v303_v14 = vsel %vm300_vm2, 1.0, %v736_v0  ;;  %v304_v15 = vsel %vm301_vm3, 1.0, %v736_v0 }
  0x42   : > { %260 = vst [vmem:[%s878_s29 + $0xc] sm:$0x3] %v736_v0  ;;  %261 = vst [vmem:[%s878_s29 + $0xe] sm:$0x3] %v736_v0  ;;  %v275_v12 = vmax.f32 %v273_v10, %v274_v11  ;;  %s507_s21 = smul.u32 288, %s722_s12  ;;  %s365_s3 = sshll.u32 %s878_s29, 4  ;;  %s916_s3 = int_to_ptr.vmem [resolvable:$true] %s365_s3 }
  0x43   : > { %262 = vst [vmem:[%s878_s29 + $0x10] sm:$0x3] %v736_v0  ;;  %s350_s15 = scalar_lea.sflag [#allocation4], %s863_s25  ;;  %s646_s16 = scalar_lea.vmem %s916_s3, 288 }
  0x44   : > { %v276_v19 = vsub.f32 %v264_v2, %v275_v12  ;;  %v277_v20 = vsub.f32 %v265_v3, %v275_v12  ;;  %v278_v21 = vsub.f32 %v266_v4, %v275_v12  ;;  %v279_v22 = vsub.f32 %v267_v5, %v275_v12  ;;  %s914_s8 = scalar_lea.hbm %s972_s2, %s507_s21  ;;  %p647_p8 = scmp.ne.s32.totalorder %s916_s3, %s646_s16 }
  0x45   : > { %s737_s30 = smov [#allocation7]  }
  0x46   : > { %v280_v26 = vmul.f32 1.442695, %v276_v19  ;;  %v282_v27 = vmul.f32 1.442695, %v277_v20  ;;  %v284_v28 = vmul.f32 1.442695, %v278_v21  ;;  %p648_p0 = pnand %p647_p8, %p806_p9 }
  0x47   : > { %v286_v29 = vmul.f32 1.442695, %v279_v22  ;;  %v320_v43 = vld [vmem:[%s878_s29] sm:$0x3]  ;;  %v321_v46 = vld [vmem:[%s878_s29 + $0x2] sm:$0x3] }
  0x48   : > { %580 = vpow2.f32 %v280_v26  ;;  %v322_v47 = vld [vmem:[%s878_s29 + $0x4] sm:$0x3]  ;;  %v490_v48 = vld [vmem:[%s878_s29 + $0x6] sm:$0x3]  ;;  %v491_v53 = vld [vmem:[%s878_s29 + $0x8] sm:$0x3]  ;;  %p649_p2 = pneg %p648_p0 }
  0x49   : > { %v496_v16 = vld [vmem:[%s878_s29 + $0xc] sm:$0x3]  ;;  %v497_v17 = vld [vmem:[%s878_s29 + $0xe] sm:$0x3]  ;;  %582 = vpow2.f32 %v282_v27  ;;  %v492_v54 = vld [vmem:[%s878_s29 + $0xa] sm:$0x3] }
  0x4a   : > { %v498_v18 = vld [vmem:[%s878_s29 + $0x10] sm:$0x3]  ;;  %v343_v23 = vadd.f32 %v496_v16, %v302_v13  ;;  %v344_v24 = vadd.f32 %v497_v17, %v303_v14  ;;  %584 = vpow2.f32 %v284_v28  ;;  %s650_s4 = sshll.u32 %s737_s30, 4  ;;  %s651_s4 = int_to_ptr.vmem [resolvable:$false] %s650_s4 }
  0x4b   : > { %v345_v25 = vadd.f32 %v498_v18, %v304_v15  ;;  %586 = vpow2.f32 %v286_v29  ;;  %s652_s6 = scalar_lea.vmem %s651_s4, 576  ;;  %p653_p5 = scmp.lt.s32.totalorder %s916_s3, %s651_s4 }
  0x4c   : > { %499 = vst [vmem:[%s878_s29 + $0xc] sm:$0x3] %v343_v23  ;;  %500 = vst [vmem:[%s878_s29 + $0xe] sm:$0x3] %v344_v24  ;;  %p654_p6 = scmp.lt.s32.totalorder %s652_s6, %s646_s16 }
  0x4d   : > { %501 = vst [vmem:[%s878_s29 + $0x10] sm:$0x3] %v345_v25 }
  0x4e   : > { %p655_p4 = por %p654_p6, %p653_p5 }
  0x50   : > { %p656_p7 = pnand %p655_p4, %p649_p2 }
  0x55   : > { %v581_v30 = vpop.eup %580 }
  0x56   : > { %v583_v31 = vpop.eup %582  ;;  %v288_v32 = vsel %vm268_vm0, %v581_v30, 0.0 }
  0x57   : > { %v585_v33 = vpop.eup %584  ;;  %v289_v34 = vsel %vm268_vm0, %v583_v31, 0.0 }
  0x58   : > { %v587_v35 = vpop.eup %586  ;;  %v290_v36 = vadd.f32 %v289_v34, %v288_v32  ;;  %v291_v37 = vsel %vm268_vm0, %v585_v33, 0.0 }
  0x59   : > { %v293_v38 = vsel %vm268_vm0, %v587_v35, 0.0 }
  0x5a   : > { %v292_v39 = vadd.f32 %v291_v37, %v290_v36 }
  0x5c   : > { %v294_v40 = vadd.f32 %v293_v38, %v292_v39 }
  0x5e   : > { %588 = vrcp.f32 %v294_v40 }
  0x6b   : > { %v589_v41 = vpop.eup %588 }
  0x6c   : > { %v296_v42 = vmul.f32 %v589_v41, %v583_v31  ;;  %v297_v44 = vmul.f32 %v589_v41, %v585_v33  ;;  %v298_v45 = vmul.f32 %v589_v41, %v587_v35 }
  0x6e   : > { %v305_v49 = vmul.f32 %v302_v13, %v296_v42  ;;  %v306_v50 = vmul.f32 %v303_v14, %v297_v44  ;;  %v307_v51 = vmul.f32 %v304_v15, %v298_v45  ;;  %v311_v52 = vmul.f32 %v296_v42, %v296_v42 }
  0x6f   : > { %v312_v55 = vmul.f32 %v297_v44, %v297_v44  ;;  %v313_v56 = vmul.f32 %v298_v45, %v298_v45 }
  0x70   : > { %v323_v57 = vadd.f32 %v320_v43, %v305_v49  ;;  %v324_v58 = vadd.f32 %v321_v46, %v306_v50  ;;  %v325_v59 = vadd.f32 %v322_v47, %v307_v51  ;;  %v333_v60 = vadd.f32 %v490_v48, %v311_v52 }
  0x71   : > { %v334_v61 = vadd.f32 %v491_v53, %v312_v55  ;;  %v335_v62 = vadd.f32 %v492_v54, %v313_v56 }
  0x72   : > { %326 = vst [vmem:[%s878_s29] sm:$0x3] %v323_v57  ;;  %327 = vst [vmem:[%s878_s29 + $0x2] sm:$0x3] %v324_v58 }
  0x73   : > { %328 = vst [vmem:[%s878_s29 + $0x4] sm:$0x3] %v325_v59  ;;  %493 = vst [vmem:[%s878_s29 + $0x6] sm:$0x3] %v333_v60 }
  0x74   : > { %494 = vst [vmem:[%s878_s29 + $0x8] sm:$0x3] %v334_v61  ;;  %495 = vst [vmem:[%s878_s29 + $0xa] sm:$0x3] %v335_v62 }
  0x75   : > { %659 = shalt.err (!%p656_p7)
}
  0x76   : > { %s660_s18 = scalar_lea.hbm %s914_s8, 288  ;;  %s664_s5 = scalar_lea.hbm %s972_s2, 576 }
  0x77   : > { %p661_p1 = scmp.ne.s32.totalorder %s914_s8, %s660_s18  ;;  %p665_p3 = scmp.lt.s32.totalorder %s914_s8, %s972_s2 }
  0x78   : > { %p666_p8 = scmp.lt.s32.totalorder %s664_s5, %s660_s18 }
  0x79   : > { %p662_p10 = pnand %p661_p1, %p806_p9 }
  0x7a   : > { %p667_p0 = por %p666_p8, %p665_p3 }
  0x7b   : > { %p663_p13 = pneg %p662_p10 }
  0x7d   : > { %p668_p2 = pnand %p667_p0, %p663_p13 }
  0x7f   : > { %671 = shalt.err (!%p668_p2)
}
  0x80   : > { %s738_s28 = smov 32   ;;  %s739_s29 = smov 2  }
  0x81   : > { %512 = dma.vmem_to_hbm [thread:$0]  (%p806_p9), %s916_s3, 288, %s914_s8, %s350_s15, %s738_s28, %s738_s28, %s739_s29  }
  0x82 PF: > { %s380_s21 = sand.u32 1, %s710_s9   ;;  %p522_p5 = pnand %p481_p12, %p813_p11 }
  0x83   : > { %s381_s12 = scalar_lea.sflag [#allocation4], %s380_s21 }
  0x84   : > { %p523_p6 = pneg %p522_p5 }
  0x86   : > { %705 = dma.done.wait (%p523_p6), %s381_s12, 288  }
  0x87   : > { %707 = vsyncadd (%p523_p6), %s381_s12, 4294967008  ;;  %s21_s14 = sadd.s32 1, %s730_s14   ;;  %s979_s9 = smov %s714_s10 }
  0x88   : > { %p18_p4 = scmp.ge.s32.totalorder %s21_s14, 4   ;;  %s980_s10 = smov %s718_s11 }
  0x89   : > { %s981_s11 = smov %s811_s23  ;;  %s982_s12 = smov %s726_s13 }
  0x8a   : > { %s983_s13 = smov %s985_s17  ;;  %20 = sbr.rel (!%p18_p4) target bundleno = 8 (0x8), region = 92 }
  0x8f   :  { %386 = vsyncpa [#allocation3], 1 }
  0x90   :  { %388 = vsyncpa [#allocation3 + $0x1], 1 }
  0x91   :  { %389 = vsyncpa [#allocation6], 1 }
  0x92   :  { %391 = vsyncpa [#allocation6 + $0x1], 1 }
  0x93   :  { %392 = vsyncpa [#allocation4], 1 }
  0x94   :  { %394 = vsyncpa [#allocation4 + $0x1], 1 }

</bundles_post_ra>
